<compile_context>
chip_gen: v6e
topology: v6e:2x2x1
jax: 0.10.0
libtpu: 0.0.40
codegen_flags: <defaults>
</compile_context>

<pallas_src>
import jax
import jax.numpy as jnp
from jax.experimental import pallas as pl
from jax.experimental.pallas import tpu as pltpu

H1 = 128        # hidden width of layer 1
H2 = 256        # hidden width of layer 2
LANE = 128      # TPU lane width
SUBLANE = 8     # TPU sublane width


def _round_up(n, m):
    return ((n + m - 1) // m) * m


def generator_kernel(x_ref, w1_ref, b1_ref, w2_ref, b2_ref, w3_ref, b3_ref,
                     o_ref):
    # One (tb, d_in) activation tile per grid step; weights are resident.
    x = x_ref[...]                                          # bf16 tile
    # Layer 1: Linear + ReLU  (bf16 MXU dot, f32 accumulate / activate)
    h1 = jnp.dot(x, w1_ref[...], preferred_element_type=jnp.float32)
    h1 = jnp.maximum(h1 + b1_ref[...], 0.0)
    # Layer 2: Linear + ReLU
    h2 = jnp.dot(h1.astype(jnp.bfloat16), w2_ref[...],
                 preferred_element_type=jnp.float32)
    h2 = jnp.maximum(h2 + b2_ref[...], 0.0)
    # Layer 3: Linear + Tanh (tanh in f32 on the EUP)
    h3 = jnp.dot(h2.astype(jnp.bfloat16), w3_ref[...],
                 preferred_element_type=jnp.float32)
    o_ref[...] = jnp.tanh(h3 + b3_ref[...]).astype(o_ref.dtype)


def init_params(key, input_dim, output_dim):
    """PyTorch-style Linear init (uniform(-1/sqrt(fan_in), 1/sqrt(fan_in))),
    zero-padded to lane-aligned shapes; weights stored pre-transposed
    (in, out) in bf16, biases (1, out) in f32."""
    d_in_pad = _round_up(input_dim, LANE)
    d_out_pad = _round_up(output_dim, LANE)

    def linear_init(k, fan_in, fan_out, fan_in_pad, fan_out_pad):
        kw, kb = jax.random.split(k)
        bound = 1.0 / jnp.sqrt(fan_in)
        w = jax.random.uniform(kw, (fan_in, fan_out), jnp.float32,
                               minval=-bound, maxval=bound)
        b = jax.random.uniform(kb, (1, fan_out), jnp.float32,
                               minval=-bound, maxval=bound)
        w_pad = jnp.zeros((fan_in_pad, fan_out_pad), jnp.float32)
        w_pad = w_pad.at[:fan_in, :fan_out].set(w)
        b_pad = jnp.zeros((1, fan_out_pad), jnp.float32)
        b_pad = b_pad.at[:, :fan_out].set(b)
        return w_pad.astype(jnp.bfloat16), b_pad

    k1, k2, k3 = jax.random.split(key, 3)
    w1, b1 = linear_init(k1, input_dim, H1, d_in_pad, H1)
    w2, b2 = linear_init(k2, H1, H2, H1, H2)
    w3, b3 = linear_init(k3, H2, output_dim, H2, d_out_pad)
    return (w1, b1, w2, b2, w3, b3)


def generator_forward(x, params, output_dim, *, block_b=512):
    """x: (B, input_dim) f32 noise. Returns (B, output_dim) f32."""
    (w1, b1, w2, b2, w3, b3) = params
    B, d_in = x.shape
    d_in_pad = w1.shape[0]
    d_out_pad = w3.shape[1]

    # Batch tile: cap at block_b, keep it a multiple of the 8-row sublane.
    tb = min(block_b, _round_up(B, SUBLANE))
    b_pad = _round_up(B, tb)

    # Zero-pad features to the lane-aligned width and batch to a tile multiple.
    xp = jnp.zeros((b_pad, d_in_pad), jnp.bfloat16)
    xp = xp.at[:B, :d_in].set(x.astype(jnp.bfloat16))

    grid = (b_pad // tb,)
    resident = lambda shape: pl.BlockSpec(shape, lambda i: (0,) * len(shape))

    out = pl.pallas_call(
        generator_kernel,
        out_shape=jax.ShapeDtypeStruct((b_pad, d_out_pad), jnp.float32),
        grid=grid,
        in_specs=[
            pl.BlockSpec((tb, d_in_pad), lambda i: (i, 0)),   # activation tile
            resident(w1.shape), resident(b1.shape),
            resident(w2.shape), resident(b2.shape),
            resident(w3.shape), resident(b3.shape),
        ],
        out_specs=pl.BlockSpec((tb, d_out_pad), lambda i: (i, 0)),
        compiler_params=pltpu.CompilerParams(
            dimension_semantics=("parallel",)),
    )(xp, w1, b1, w2, b2, w3, b3)

    return out[:B, :output_dim]


def reference_forward(x, params, output_dim):
    """Pure-JAX reference with the same bf16 rounding of the dot inputs."""
    (w1, b1, w2, b2, w3, b3) = params
    d_in = x.shape[1]
    bf = lambda a: a.astype(jnp.bfloat16).astype(jnp.float32)
    w1f = w1.astype(jnp.float32)[:d_in]
    w2f = w2.astype(jnp.float32)
    w3f = w3.astype(jnp.float32)
    h1 = jnp.maximum(bf(x) @ w1f + b1, 0.0)
    h2 = jnp.maximum(bf(h1) @ w2f + b2, 0.0)
    h3 = bf(h2) @ w3f + b3
    return jnp.tanh(h3)[:, :output_dim]


if __name__ == "__main__":
    # TODO(synk): dataframe loading / GAN training loop from the script are
    # host-side and out of scope; only the Generator forward is implemented.
    input_dim = 100   # noise dim, from the PyTorch script
    output_dim = 30   # stand-in for positive_class_data.shape[1]
    batch = 64        # small test batch (multiple of the 8-row sublane)

    key = jax.random.PRNGKey(0)
    k_params, k_x = jax.random.split(key)
    params = init_params(k_params, input_dim, output_dim)
    x = jax.random.normal(k_x, (batch, input_dim), jnp.float32)

    # block_b=32 here just to exercise the batch grid / pipelining path;
    # production callers keep the default (512) for large noise batches.
    out = generator_forward(x, params, output_dim, block_b=32)
    out = jax.block_until_ready(out)

    ref = reference_forward(x, params, output_dim)
    assert out.shape == (batch, output_dim)
    assert jnp.allclose(out, ref, atol=5e-3, rtol=5e-3), "mismatch vs reference"

    print("KERNEL_OK")
</pallas_src>

<mosaic_0001>
module attributes {stable_mosaic.version = 11 : i64} {
  func.func @generator_kernel(%arg0: i32, %arg1: memref<32x128xbf16, #tpu.memory_space<vmem>>, %arg2: memref<128x128xbf16, #tpu.memory_space<vmem>>, %arg3: memref<1x128xf32, #tpu.memory_space<vmem>>, %arg4: memref<128x256xbf16, #tpu.memory_space<vmem>>, %arg5: memref<1x256xf32, #tpu.memory_space<vmem>>, %arg6: memref<256x128xbf16, #tpu.memory_space<vmem>>, %arg7: memref<1x128xf32, #tpu.memory_space<vmem>>, %arg8: memref<32x128xf32, #tpu.memory_space<vmem>>) attributes {dimension_semantics = [#tpu.dimension_semantics<parallel>], iteration_bounds = array<i64: 2>, scalar_prefetch = 0 : i64, scratch_operands = 0 : i64, tpu.core_type = #tpu.core_type<tc>, window_params = [{transform_indices = @transform_0, window_bounds = array<i64: 32, 128>}, {pipeline_mode = #tpu.pipeline_mode<synchronous>, transform_indices = @transform_1, window_bounds = array<i64: 128, 128>}, {pipeline_mode = #tpu.pipeline_mode<synchronous>, transform_indices = @transform_2, window_bounds = array<i64: 1, 128>}, {pipeline_mode = #tpu.pipeline_mode<synchronous>, transform_indices = @transform_3, window_bounds = array<i64: 128, 256>}, {pipeline_mode = #tpu.pipeline_mode<synchronous>, transform_indices = @transform_4, window_bounds = array<i64: 1, 256>}, {pipeline_mode = #tpu.pipeline_mode<synchronous>, transform_indices = @transform_5, window_bounds = array<i64: 256, 128>}, {pipeline_mode = #tpu.pipeline_mode<synchronous>, transform_indices = @transform_6, window_bounds = array<i64: 1, 128>}, {transform_indices = @transform_7, window_bounds = array<i64: 32, 128>}]} {
    %c0 = arith.constant 0 : index
    %c0_0 = arith.constant 0 : index
    %0 = vector.load %arg1[%c0, %c0_0] : memref<32x128xbf16, #tpu.memory_space<vmem>>, vector<32x128xbf16>
    %c0_1 = arith.constant 0 : index
    %c0_2 = arith.constant 0 : index
    %1 = vector.load %arg2[%c0_1, %c0_2] : memref<128x128xbf16, #tpu.memory_space<vmem>>, vector<128x128xbf16>
    %cst = arith.constant dense<0.000000e+00> : vector<32x128xf32>
    %2 = tpu.matmul %0, %1, %cst {dimension_numbers = #tpu.dot_dimension_numbers<[1], [0], [0], [1], [0, 0, 1, 1], [], []>} : vector<32x128xbf16>, vector<128x128xbf16>, vector<32x128xf32> -> vector<32x128xf32>
    %c0_3 = arith.constant 0 : index
    %c0_4 = arith.constant 0 : index
    %3 = vector.load %arg3[%c0_3, %c0_4] : memref<1x128xf32, #tpu.memory_space<vmem>>, vector<1x128xf32>
    %4 = vector.broadcast %3 : vector<1x128xf32> to vector<32x128xf32>
    %5 = arith.addf %2, %4 : vector<32x128xf32>
    %cst_5 = arith.constant 0.000000e+00 : f32
    %6 = vector.broadcast %cst_5 : f32 to vector<32x128xf32>
    %7 = arith.maximumf %5, %6 : vector<32x128xf32>
    %8 = arith.truncf %7 : vector<32x128xf32> to vector<32x128xbf16>
    %c0_6 = arith.constant 0 : index
    %c0_7 = arith.constant 0 : index
    %9 = vector.load %arg4[%c0_6, %c0_7] : memref<128x256xbf16, #tpu.memory_space<vmem>>, vector<128x256xbf16>
    %cst_8 = arith.constant dense<0.000000e+00> : vector<32x256xf32>
    %10 = tpu.matmul %8, %9, %cst_8 {dimension_numbers = #tpu.dot_dimension_numbers<[1], [0], [0], [1], [0, 0, 1, 1], [], []>} : vector<32x128xbf16>, vector<128x256xbf16>, vector<32x256xf32> -> vector<32x256xf32>
    %c0_9 = arith.constant 0 : index
    %c0_10 = arith.constant 0 : index
    %11 = vector.load %arg5[%c0_9, %c0_10] : memref<1x256xf32, #tpu.memory_space<vmem>>, vector<1x256xf32>
    %12 = vector.broadcast %11 : vector<1x256xf32> to vector<32x256xf32>
    %13 = arith.addf %10, %12 : vector<32x256xf32>
    %cst_11 = arith.constant 0.000000e+00 : f32
    %14 = vector.broadcast %cst_11 : f32 to vector<32x256xf32>
    %15 = arith.maximumf %13, %14 : vector<32x256xf32>
    %16 = arith.truncf %15 : vector<32x256xf32> to vector<32x256xbf16>
    %c0_12 = arith.constant 0 : index
    %c0_13 = arith.constant 0 : index
    %17 = vector.load %arg6[%c0_12, %c0_13] : memref<256x128xbf16, #tpu.memory_space<vmem>>, vector<256x128xbf16>
    %cst_14 = arith.constant dense<0.000000e+00> : vector<32x128xf32>
    %18 = tpu.matmul %16, %17, %cst_14 {dimension_numbers = #tpu.dot_dimension_numbers<[1], [0], [0], [1], [0, 0, 1, 1], [], []>} : vector<32x256xbf16>, vector<256x128xbf16>, vector<32x128xf32> -> vector<32x128xf32>
    %c0_15 = arith.constant 0 : index
    %c0_16 = arith.constant 0 : index
    %19 = vector.load %arg7[%c0_15, %c0_16] : memref<1x128xf32, #tpu.memory_space<vmem>>, vector<1x128xf32>
    %20 = vector.broadcast %19 : vector<1x128xf32> to vector<32x128xf32>
    %21 = arith.addf %18, %20 : vector<32x128xf32>
    %22 = math.tanh %21 : vector<32x128xf32>
    %c0_17 = arith.constant 0 : index
    %c0_18 = arith.constant 0 : index
    %23 = vector.load %arg8[%c0_17, %c0_18] : memref<32x128xf32, #tpu.memory_space<vmem>>, vector<32x128xf32>
    tpu.vector_store %arg8[%c0_17, %c0_18], %22 {strides = array<i32>} : memref<32x128xf32, #tpu.memory_space<vmem>>, vector<32x128xf32>,
    return
  }
  func.func @transform_0(%arg0: i32) -> (i32, i32) {
    %c0_i32 = arith.constant 0 : i32
    %c0_i32_0 = arith.constant 0 : i32
    return %arg0, %c0_i32 : i32, i32
  }
  func.func @transform_1(%arg0: i32) -> (i32, i32) {
    %c0_i32 = arith.constant 0 : i32
    %c0_i32_0 = arith.constant 0 : i32
    %c0_i32_1 = arith.constant 0 : i32
    return %c0_i32, %c0_i32_0 : i32, i32
  }
  func.func @transform_2(%arg0: i32) -> (i32, i32) {
    %c0_i32 = arith.constant 0 : i32
    %c0_i32_0 = arith.constant 0 : i32
    %c0_i32_1 = arith.constant 0 : i32
    return %c0_i32, %c0_i32_0 : i32, i32
  }
  func.func @transform_3(%arg0: i32) -> (i32, i32) {
    %c0_i32 = arith.constant 0 : i32
    %c0_i32_0 = arith.constant 0 : i32
    %c0_i32_1 = arith.constant 0 : i32
    return %c0_i32, %c0_i32_0 : i32, i32
  }
  func.func @transform_4(%arg0: i32) -> (i32, i32) {
    %c0_i32 = arith.constant 0 : i32
    %c0_i32_0 = arith.constant 0 : i32
    %c0_i32_1 = arith.constant 0 : i32
    return %c0_i32, %c0_i32_0 : i32, i32
  }
  func.func @transform_5(%arg0: i32) -> (i32, i32) {
    %c0_i32 = arith.constant 0 : i32
    %c0_i32_0 = arith.constant 0 : i32
    %c0_i32_1 = arith.constant 0 : i32
    return %c0_i32, %c0_i32_0 : i32, i32
  }
  func.func @transform_6(%arg0: i32) -> (i32, i32) {
    %c0_i32 = arith.constant 0 : i32
    %c0_i32_0 = arith.constant 0 : i32
    %c0_i32_1 = arith.constant 0 : i32
    return %c0_i32, %c0_i32_0 : i32, i32
  }
  func.func @transform_7(%arg0: i32) -> (i32, i32) {
    %c0_i32 = arith.constant 0 : i32
    %c0_i32_0 = arith.constant 0 : i32
    return %arg0, %c0_i32 : i32, i32
  }
}

</mosaic_0001>

<bundles_post_ra>
// kernel: tpu_custom_call.1
= control target key start
LH: loop header
LB: loop body
LE: loop exit
PB: predicated region body
PF: predicated region fallthrough
CT: control target
= control target key end

     0   :  { %s1704_s0 = inlined_call_operand.hbm [shape: bf16[64,128], index: 0, kind: input, shape index: {}]   ;;  %s1705_s1 = inlined_call_operand.hbm [shape: bf16[128,128], index: 1, kind: input, shape index: {}]   ;;  %s1706_s2 = inlined_call_operand.vmem [shape: f32[1,128], index: 2, kind: input, shape index: {}]   ;;  %s1707_s3 = inlined_call_operand.hbm [shape: bf16[128,256], index: 3, kind: input, shape index: {}]   ;;  %s1708_s4 = inlined_call_operand.vmem [shape: f32[1,256], index: 4, kind: input, shape index: {}]   ;;  %s1709_s5 = inlined_call_operand.hbm [shape: bf16[256,128], index: 5, kind: input, shape index: {}]   ;;  %s1710_s6 = inlined_call_operand.vmem [shape: f32[1,128], index: 6, kind: input, shape index: {}]   ;;  %s1711_s7 = inlined_call_operand.hbm [shape: f32[64,128], index: 7, kind: output, shape index: {}]  }
   0x1   :  { %1718 = sst [smem:[#allocation15_spill]] %s1705_s1 }
   0x2   :  { %12 = vsyncpa [#allocation3], 0 }
   0x3   :  { %14 = vsyncpa [#allocation3 + $0x1], 0 }
   0x4   :  { %15 = vsyncpa [#allocation6], 0 }
   0x5   :  { %16 = vsyncpa [#allocation9], 0 }
   0x6   :  { %17 = vsyncpa [#allocation4], 0 }
   0x7   :  { %19 = vsyncpa [#allocation4 + $0x1], 0  ;;  %s1481_s24 = smov 0   ;;  %s1483_s25 = smov 0  }
   0x8   :  { %s1485_s26 = smov 0   ;;  %s1487_s27 = smov 0  }
   0x9 LB: > { %s1502_s28 = sadd.s32 4294967295, %s1427_s27   ;;  %s967_s29 = sadd.s32 4294967294, %s1427_s27   ;;  %s1427_s27 = sphi %s1487_s27, %s1740_s27   ;;  %s1423_s26 = sphi %s1485_s26, %s1739_s26   ;;  %s1419_s25 = sphi %s1483_s25, %s1738_s25   ;;  %s1415_s24 = sphi %s1481_s24, %s1737_s24  }
   0xa   : > { %p45_p0 = scmp.ne.s32.totalorder %s1419_s25, %s1415_s24  ;;  %p1713_p1 = scmp.eq.s32.totalorder %s1502_s28, 0 }
   0xb   : > { %p195_p2 = scmp.eq.s32.totalorder %s1502_s28, 1  ;;  %p201_p3 = scmp.eq.s32.totalorder %s967_s29, 1 }
   0xc   : > { %p1511_p4 = por %p1713_p1, %p45_p0  ;;  %p968_p5 = scmp.ge.s32.totalorder %s1427_s27, 1 }
   0xd   : > { %p1516_p6 = por %p201_p3, %p45_p0  ;;  %p208_p7 = scmp.lt.s32.totalorder %s1427_s27, 3 }
   0xe   : > { %s1719_s30 = scalar_select %p1511_p4, 1, 0 }
   0xf   : > { %s1720_s8 = scalar_select %p1516_p6, 1, 0 }
  0x10   : > { %p1521_p8 = pnand %p968_p5, %p208_p7  ;;  %s1429_s10 = smov [#allocation5]  }
  0x11   : > { %s220_s11 = sshll.u32 %s1429_s10, 4  ;;  %s1430_s13 = smov [#allocation7]   ;;  %s221_s11 = int_to_ptr.vmem [resolvable:$true] %s220_s11 }
  0x12   : > { %s1721_s9 = scalar_select %p1521_p8, 1, 0 }
  0x13   : > { %p1123_p9 = pneg %p1521_p8  ;;  %s236_s14 = sshll.u32 %s1430_s13, 4  ;;  %s237_s14 = int_to_ptr.vmem [resolvable:$true] %s236_s14 }
  0x14   : > { %s1260_s15 = scalar_lea.vmem %s221_s11, 1024  ;;  %p1268_p5 = scmp.lt.s32.totalorder %s221_s11, %s221_s11 }
  0x15   : > { %p1530_p11 = pnand %p1123_p9, %p1713_p1  ;;  %p1261_p13 = scmp.ne.s32.totalorder %s221_s11, %s1260_s15 }
  0x16   : > { %p1269_p7 = scmp.lt.s32.totalorder %s1260_s15, %s1260_s15 }
  0x17   : > { %p1251_p12 = pneg %p1530_p11 }
  0x18   : > { %p1270_p10 = por %p1269_p7, %p1268_p5 }
  0x19   : > { %p1263_p0 = pnand %p1261_p13, %p1251_p12 }
  0x1b   : > { %p1264_p3 = pneg %p1263_p0 }
  0x1d   : > { %p1271_p9 = pnand %p1270_p10, %p1264_p3 }
  0x1f   : > { %1274 = shalt.err (!%p1271_p9)
}
  0x20   : > { %s1712_s16 = smov 64   ;;  %s1714_s17 = smov 4  }
  0x21   : > { %s1723_s1 = sld [smem:[#allocation15_spill]]  ;;  %s1286_s20 = scalar_lea.vmem %s237_s14, 2048 }
  0x22   : > { %p1287_p13 = scmp.ne.s32.totalorder %s237_s14, %s1286_s20  ;;  %p1294_p10 = scmp.lt.s32.totalorder %s237_s14, %s237_s14 }
  0x23   : > { %p1295_p3 = scmp.lt.s32.totalorder %s1286_s20, %s1286_s20 }
  0x24   : > { %p1289_p0 = pnand %p1287_p13, %p1251_p12 }
  0x25   : > { %p1296_p7 = por %p1295_p3, %p1294_p10 }
  0x26   : > { %p1290_p5 = pneg %p1289_p0 }
  0x27   : > { %1126 = dma.hbm_to_vmem [thread:$0]  (!%p1530_p11), %s1723_s1, 1024, %s221_s11, [#allocation6], %s1712_s16, %s1712_s16, %s1714_s17  }
  0x28   : > { %p1297_p9 = pnand %p1296_p7, %p1290_p5 }
  0x2a   : > { %1300 = shalt.err (!%p1297_p9)
}
  0x2b   : > { %s1433_s21 = smov 128   ;;  %s1434_s22 = smov 8  }
  0x2c   : > { %1129 = dma.hbm_to_vmem [thread:$0]  (!%p1530_p11), %s1707_s3, 2048, %s237_s14, [#allocation6], %s1433_s21, %s1433_s21, %s1434_s22  }
  0x2d   : > { %s1435_s10 = smov [#allocation8]   ;;  %s1556_s13 = sadd.s32 1, %s1427_s27  }
  0x2e   : > { %s252_s11 = sshll.u32 %s1435_s10, 4  ;;  %s253_s11 = int_to_ptr.vmem [resolvable:$true] %s252_s11 }
  0x2f   : > { %s1312_s15 = scalar_lea.vmem %s253_s11, 2048  ;;  %p1320_p10 = scmp.lt.s32.totalorder %s253_s11, %s253_s11 }
  0x30   : > { %p1313_p13 = scmp.ne.s32.totalorder %s253_s11, %s1312_s15  ;;  %p1321_p3 = scmp.lt.s32.totalorder %s1312_s15, %s1312_s15 }
  0x32   : > { %p1315_p0 = pnand %p1313_p13, %p1251_p12  ;;  %p1322_p7 = por %p1321_p3, %p1320_p10 }
  0x34   : > { %p1316_p5 = pneg %p1315_p0 }
  0x36   : > { %p1323_p9 = pnand %p1322_p7, %p1316_p5 }
  0x38   : > { %1326 = shalt.err (!%p1323_p9)
}
  0x39   : > { %1132 = dma.hbm_to_vmem [thread:$0]  (!%p1530_p11), %s1709_s5, 2048, %s253_s11, [#allocation9], %s1712_s16, %s1712_s16, %s1714_s17  }
  0x3a   : > { %s29_s19 = ssub.s32 %s1427_s27, %s1556_s13  ;;  %s32_s12 = sadd.s32 1, %s1423_s26 }
  0x3b   : > { %p30_p12 = scmp.eq.s32.totalorder %s29_s19, 0  ;;  %p39_p13 = scmp.ne.s32.totalorder %s1423_s26, %s1419_s25 }
  0x3c   : > { %p40_p0 = scmp.eq.s32.totalorder %s1427_s27, 0  ;;  %p1144_p5 = scmp.lt.s32.totalorder %s1427_s27, 2 }
  0x3d   : > { %s1577_s20 = scalar_select %p30_p12, %s1423_s26, %s32_s12  }
  0x3e   : > { %p41_p10 = por %p40_p0, %p39_p13  ;;  %p1581_p3 = por %p195_p2, %p39_p13 }
  0x3f   : > { %s269_s22 = sand.u32 1, %s1423_s26   ;;  %s1031_s23 = sshll.u32 %s1427_s27, 8 }
  0x40   : > { %s1724_s21 = scalar_select %p1581_p3, 1, 0 }
  0x41   : > { %s973_s29 = sshll.u32 %s269_s22, 4  ;;  %s1590_s11 = scalar_lea.hbm %s1704_s0, %s1031_s23 }
  0x42   : > { %s273_s14 = scalar_lea.vmem [#allocation2], %s973_s29  ;;  %p1592_p11 = pnand %p1144_p5, %p41_p10 }
  0x43   : > { %s280_s18 = sshll.u32 %s273_s14, 4  ;;  %s1598_s12 = scalar_lea.sflag [#allocation3], %s269_s22  ;;  %s1596_s18 = int_to_ptr.vmem [resolvable:$true] %s280_s18 }
  0x44   : > { %s1327_s16 = scalar_lea.hbm %s1590_s11, 256  ;;  %p1329_p7 = pneg %p1592_p11 }
  0x45   : > { %p1328_p2 = scmp.ne.s32.totalorder %s1590_s11, %s1327_s16  ;;  %s1332_s29 = scalar_lea.hbm %s1704_s0, 512 }
  0x46   : > { %p1333_p13 = scmp.lt.s32.totalorder %s1590_s11, %s1704_s0  ;;  %p1334_p0 = scmp.lt.s32.totalorder %s1332_s29, %s1327_s16 }
  0x47   : > { %p1330_p9 = pnand %p1329_p7, %p1328_p2 }
  0x48   : > { %p1335_p5 = por %p1334_p0, %p1333_p13 }
  0x49   : > { %p1331_p12 = pneg %p1330_p9 }
  0x4b   : > { %p1336_p10 = pnand %p1335_p5, %p1331_p12 }
  0x4d   : > { %1339 = shalt.err (!%p1336_p10)
}
  0x4e   : > { %s1340_s22 = scalar_lea.vmem %s1596_s18, 256  ;;  %s1436_s17 = smov [#allocation2]  }
  0x4f   : > { %p1341_p1 = scmp.ne.s32.totalorder %s1596_s18, %s1340_s22  ;;  %s1345_s1 = sshll.u32 %s1436_s17, 4  ;;  %s1346_s1 = int_to_ptr.vmem [resolvable:$false] %s1345_s1 }
  0x50   : > { %s1347_s23 = scalar_lea.vmem %s1346_s1, 512  ;;  %p1348_p9 = scmp.lt.s32.totalorder %s1596_s18, %s1346_s1 }
  0x51   : > { %p1343_p6 = pnand %p1341_p1, %p1329_p7  ;;  %p1349_p3 = scmp.lt.s32.totalorder %s1347_s23, %s1340_s22 }
  0x53   : > { %p1344_p2 = pneg %p1343_p6  ;;  %p1350_p4 = por %p1349_p3, %p1348_p9 }
  0x55   : > { %p1351_p8 = pnand %p1350_p4, %p1344_p2 }
  0x57   : > { %1354 = shalt.err (!%p1351_p8)
}
  0x58   : > { %s1726_s16 = smov 4   ;;  %s1727_s10 = smov 64  }
  0x59   : > { %1136 = dma.hbm_to_vmem [thread:$0]  (!%p1592_p11), %s1590_s11, 256, %s1596_s18, %s1598_s12, %s1727_s10, %s1727_s10, %s1726_s16  }
  0x5a   : > { %p1728_p1 = scmp.ne.s32.totalorder %s1721_s9, 0 }
  0x5b   : > { %s1625_s17 = sand.u32 (!%p1728_p1), 1, %s1419_s25   ;;  %p1729_p4 = scmp.ne.s32.totalorder (!%p1728_p1), %s1719_s30, 0 }
  0x5c   : > { %292 = sbr.rel (%p1728_p1) target bundleno = 787 (0x313), region = 48  ;;  %s977_s1 = sshll.u32 (!%p1728_p1), %s1625_s17, 4 }
  0x5d   : > { %s295_s29 = scalar_lea.sflag (!%p1728_p1), [#allocation3], %s1625_s17  ;;  %s1629_s15 = scalar_lea.vmem (!%p1728_p1), [#allocation2], %s977_s1 }
  0x61   : > { %1398 = dma.done.wait (%p1729_p4), %s295_s29, 256  }
  0x62   : > { %1400 = vsyncadd (%p1729_p4), %s295_s29, 4294967040  ;;  %p1730_p6 = scmp.eq.s32.totalorder %s1502_s28, 0 }
  0x64   : > { %1402 = dma.done.wait (%p1730_p6), [#allocation6], 3072   ;;  %p1731_p8 = pmov %p1730_p6 }
  0x65   : > { %p1732_p3 = pmov %p1730_p6 }
  0x66   : > { %1404 = vsyncadd (%p1731_p8), [#allocation6], 4294964224 }
  0x67   : > { %1406 = dma.done.wait (%p1732_p3), [#allocation9], 2048   ;;  %p1733_p11 = pmov %p1732_p3 }
  0x68   : > { %v1191_v0 = vld [vmem:[#allocation5 + $0x38] sm:$0xff]   ;;  %v1192_v1 = vld [vmem:[#allocation5 + $0x30] sm:$0xff]   ;;  %v1193_v2 = vld [vmem:[#allocation5 + $0x28] sm:$0xff]   ;;  %v1437_v26 = vmov 0   ;;  %v504_v58 = vlaneseq  ;;  %s981_s14 = sshll.u32 %s1625_s17, 5  ;;  %s1032_s23 = sshll.u32 %s1502_s28, 9 }
  0x69   : > { %1408 = vsyncadd (%p1733_p11), [#allocation9], 4294965248  ;;  %1071 = vmatprep.subr.bf16.mxu0 %v1191_v0  ;;  %v1194_v3 = vld [vmem:[#allocation5 + $0x20] sm:$0xff]   ;;  %v1201_v5 = vld [vmem:[#allocation7 + $0x74] ss:$8 sps:$4 sm:$0xff]   ;;  %626 = vmatprep.mubr.bf16.mxu1 %v1437_v26  ;;  %s340_s22 = scalar_lea.vmem [#allocation10], %s981_s14  ;;  %s1659_s29 = scalar_lea.hbm %s1711_s7, %s1032_s23 }
  0x6a   : > { %1072 = vmatpush3.bf16.msra.mxu0 %v1191_v0  ;;  %v1199_v4 = vld [vmem:[%s1629_s15] sm:$0xff]   ;;  %v1195_v7 = vld [vmem:[#allocation5 + $0x18] sm:$0xff]   ;;  %594 = vmatprep.subr.bf16.mxu1 %v1201_v5  ;;  %v1197_v14 = vld [vmem:[#allocation5 + $0x8] sm:$0xff]   ;;  %v505_v59 = vshrl.u32 %v504_v58, 7  ;;  %s865_s16 = sshll.u32 %s340_s22, 4  ;;  %p1734_p12 = scmp.ne.s32.totalorder %s1724_s21, 0  ;;  %s1661_s16 = int_to_ptr.vmem [resolvable:$true] %s865_s16 }
  0x6b   : > { %1073 = vmatprep.subr.bf16.mxu0 %v1192_v1  ;;  %1087 = vmatprep.mubr.bf16.mxu0 %v1199_v4  ;;  %v1203_v6 = vld [vmem:[#allocation7 + $0x70] ss:$8 sps:$4 sm:$0xff]   ;;  %v1204_v8 = vld [vmem:[#allocation7 + $0x64] ss:$8 sps:$4 sm:$0xff]   ;;  %v1206_v9 = vld [vmem:[#allocation7 + $0x60] ss:$8 sps:$4 sm:$0xff]  }
  0x6c   : > { %595 = vmatpush1.bf16.msra.mxu1 %v1203_v6  ;;  %v1207_v10 = vld [vmem:[#allocation7 + $0x54] ss:$8 sps:$4 sm:$0xff]   ;;  %v1209_v12 = vld [vmem:[#allocation7 + $0x50] ss:$8 sps:$4 sm:$0xff]   ;;  %v1210_v13 = vld [vmem:[#allocation7 + $0x44] ss:$8 sps:$4 sm:$0xff]  }
  0x6d   : > { %596 = vmatprep.subr.bf16.mxu1 %v1204_v8  ;;  %v1196_v11 = vld [vmem:[#allocation5 + $0x10] sm:$0xff]   ;;  %v1212_v15 = vld [vmem:[#allocation7 + $0x40] ss:$8 sps:$4 sm:$0xff]   ;;  %v1216_v20 = vld [vmem:[#allocation7 + $0x24] ss:$8 sps:$4 sm:$0xff]   ;;  %v510_v60 = vsub.s32 1, %v505_v59 }
  0x6e   : > { %1074 = vmatpush3.bf16.msra.mxu0 %v1192_v1  ;;  %v1213_v16 = vld [vmem:[#allocation7 + $0x34] ss:$8 sps:$4 sm:$0xff]   ;;  %v1198_v17 = vld [vmem:[#allocation5] sm:$0xff]   ;;  %v1215_v18 = vld [vmem:[#allocation7 + $0x30] ss:$8 sps:$4 sm:$0xff]   ;;  %v506_v61 = vsub.s32 0, %v505_v59 }
  0x6f   : > { %1075 = vmatprep.subr.bf16.mxu0 %v1193_v2  ;;  %v1200_v19 = vld [vmem:[%s1629_s15 + $0x8] sm:$0xff]   ;;  %v1227_v29 = vld [vmem:[#allocation8 + $0x70] sm:$0xff]   ;;  %v1231_v33 = vld [vmem:[#allocation8 + $0x60] sm:$0xff]   ;;  %s852_s15 = scalar_lea.sflag [#allocation4], %s1625_s17  ;;  %s1355_s30 = scalar_lea.vmem %s1661_s16, 512 }
  0x70   : > { %597 = vmatpush1.bf16.msra.mxu1 %v1206_v9  ;;  %v1218_v21 = vld [vmem:[#allocation7 + $0x20] ss:$8 sps:$4 sm:$0xff]   ;;  %v1219_v22 = vld [vmem:[#allocation7 + $0x14] ss:$8 sps:$4 sm:$0xff]   ;;  %v1221_v23 = vld [vmem:[#allocation7 + $0x10] ss:$8 sps:$4 sm:$0xff]   ;;  %p1356_p7 = scmp.ne.s32.totalorder %s1661_s16, %s1355_s30 }
  0x71   : > { %598 = vmatprep.subr.bf16.mxu1 %v1207_v10  ;;  %v1222_v24 = vld [vmem:[#allocation7 + $0x4] ss:$8 sps:$4 sm:$0xff]   ;;  %v1224_v25 = vld [vmem:[#allocation7] ss:$8 sps:$4 sm:$0xff]   ;;  %v1225_v27 = vld [vmem:[#allocation8 + $0x78] sm:$0xff]   ;;  %s1438_s28 = smov [#allocation10]  }
  0x72   : > { %1076 = vmatpush3.bf16.msra.mxu0 %v1193_v2  ;;  %v1226_v28 = vld [vmem:[#allocation8 + $0x38] sm:$0xff]   ;;  %v1228_v30 = vld [vmem:[#allocation8 + $0x30] sm:$0xff]   ;;  %v1229_v31 = vld [vmem:[#allocation8 + $0x68] sm:$0xff]   ;;  %p1357_p13 = pnand %p1356_p7, %p1734_p12  ;;  %s1359_s9 = sshll.u32 %s1438_s28, 4  ;;  %s1360_s9 = int_to_ptr.vmem [resolvable:$false] %s1359_s9 }
  0x73   : > { %1077 = vmatprep.subr.bf16.mxu0 %v1194_v3  ;;  %v1230_v32 = vld [vmem:[#allocation8 + $0x28] sm:$0xff]   ;;  %v1232_v34 = vld [vmem:[#allocation8 + $0x20] sm:$0xff]   ;;  %v1233_v35 = vld [vmem:[#allocation8 + $0x58] sm:$0xff]   ;;  %s1361_s11 = scalar_lea.vmem %s1360_s9, 1024  ;;  %p1362_p5 = scmp.lt.s32.totalorder %s1661_s16, %s1360_s9 }
  0x74   : > { %599 = vmatpush1.bf16.msra.mxu1 %v1209_v12  ;;  %v1234_v36 = vld [vmem:[#allocation8 + $0x18] sm:$0xff]   ;;  %v982_v39 = vld [vmem:[%s1706_s2] ss:$0 sm:$0xff]  ;;  %v1235_v52 = vld [vmem:[#allocation8 + $0x50] sm:$0xff]   ;;  %p1358_p0 = pneg %p1357_p13  ;;  %p1363_p10 = scmp.lt.s32.totalorder %s1361_s11, %s1355_s30 }
  0x75   : > { %600 = vmatprep.subr.bf16.mxu1 %v1210_v13  ;;  %v1236_v53 = vld [vmem:[#allocation8 + $0x10] sm:$0xff]   ;;  %v1237_v54 = vld [vmem:[#allocation8 + $0x48] sm:$0xff]   ;;  %v1239_v56 = vld [vmem:[#allocation8 + $0x40] sm:$0xff]  }
  0x76   : > { %1078 = vmatpush3.bf16.msra.mxu0 %v1194_v3  ;;  %v1238_v55 = vld [vmem:[#allocation8 + $0x8] sm:$0xff]   ;;  %v1240_v57 = vld [vmem:[#allocation8] sm:$0xff]   ;;  %p1364_p2 = por %p1363_p10, %p1362_p5 }
  0x77   : > { %1079 = vmatprep.subr.bf16.mxu0 %v1195_v7  ;;  %v502_v62 = vld [vmem:[%s1708_s4] sm:$0x3] }
  0x78   : > { %601 = vmatpush1.bf16.msra.mxu1 %v1212_v15  ;;  %v511_v0 = vrot.slane %v502_v62, %v510_v60  ;;  %v507_v1 = vrot.slane %v502_v62, %v506_v61  ;;  %p1365_p9 = pnand %p1364_p2, %p1358_p0 }
  0x79   : > { %602 = vmatprep.subr.bf16.mxu1 %v1213_v16 }
  0x7a   : > { %1080 = vmatpush3.bf16.msra.mxu0 %v1195_v7 }
  0x7b   : > { %1081 = vmatprep.subr.bf16.mxu0 %v1196_v11 }
  0x7c   : > { %603 = vmatpush1.bf16.msra.mxu1 %v1215_v18 }
  0x7d   : > { %604 = vmatprep.subr.bf16.mxu1 %v1216_v20 }
  0x7e   : > { %1082 = vmatpush3.bf16.msra.mxu0 %v1196_v11 }
  0x7f   : > { %1083 = vmatprep.subr.bf16.mxu0 %v1197_v14 }
  0x80   : > { %605 = vmatpush1.bf16.msra.mxu1 %v1218_v21 }
  0x81   : > { %606 = vmatprep.subr.bf16.mxu1 %v1219_v22 }
  0x82   : > { %1084 = vmatpush3.bf16.msra.mxu0 %v1197_v14 }
  0x83   : > { %1085 = vmatprep.subr.bf16.mxu0 %v1198_v17 }
  0x84   : > { %607 = vmatpush1.bf16.msra.mxu1 %v1221_v23 }
  0x85   : > { %608 = vmatprep.subr.bf16.mxu1 %v1222_v24 }
  0x86   : > { %1086 = vmatpush3.bf16.msra.mxu0 %v1198_v17 }
  0x87   : > { %1043 = vmatprep.subr.bf16.mxu0 %v1225_v27 }
  0x88   : > { %609 = vmatpush1.bf16.msra.mxu1 %v1224_v25 }
  0x89   : > { %1088 = vmatmul.mubr.bf16.vlgmr.msra.gmra.mxu0 %v1200_v19  ;;  %1091 = vmatprep.subr.bf16.mxu1 %v1225_v27 }
  0x8a   : > { %1044 = vmatpush3.bf16.msra.mxu0 %v1226_v28 }
  0x8b   : > { %1045 = vmatprep.subr.bf16.mxu0 %v1227_v29 }
  0x8e   : > { %1046 = vmatpush3.bf16.msra.mxu0 %v1228_v30 }
  0x8f   : > { %1047 = vmatprep.subr.bf16.mxu0 %v1229_v31 }
  0x92   : > { %1048 = vmatpush3.bf16.msra.mxu0 %v1230_v32 }
  0x93   : > { %1049 = vmatprep.subr.bf16.mxu0 %v1231_v33 }
  0x96   : > { %1050 = vmatpush3.bf16.msra.mxu0 %v1232_v34 }
  0x97   : > { %1051 = vmatprep.subr.bf16.mxu0 %v1233_v35 }
  0x9a   : > { %1052 = vmatpush3.bf16.msra.mxu0 %v1234_v36 }
  0x9b   : > { %1053 = vmatprep.subr.bf16.mxu0 %v1235_v52 }
  0x9e   : > { %1054 = vmatpush3.bf16.msra.mxu0 %v1236_v53 }
  0x9f   : > { %1055 = vmatprep.subr.bf16.mxu0 %v1237_v54 }
  0xa2   : > { %1056 = vmatpush3.bf16.msra.mxu0 %v1238_v55 }
  0xa3   : > { %1057 = vmatprep.subr.bf16.mxu0 %v1239_v56 }
  0xa6   : > { %1058 = vmatpush3.bf16.msra.mxu0 %v1240_v57 }
 0x149   : > { %v1089_v37 = vpop.f32.mrf.mxu0 }
 0x14a   : > { %v474_v48 = vadd.f32 %v1089_v37, %v982_v39 }
 0x14b   : > { %v465_v38 = vpop.f32.mrf.mxu0 }
 0x14c   : > { %v466_v41 = vadd.f32 %v982_v39, %v465_v38  ;;  %v482_v50 = vmax.f32 %v474_v48, 0.0 }
 0x14d   : > { %v1090_v40 = vpop.f32.mrf.mxu0 }
 0x14e   : > { %v480_v44 = vmax.f32 %v466_v41, 0.0  ;;  %v477_v46 = vadd.f32 %v1090_v40, %v982_v39 }
 0x14f   : > { %v468_v42 = vpop.f32.mrf.mxu0 }
 0x150   : > { %v469_v43 = vadd.f32 %v982_v39, %v468_v42  ;;  %v483_v49 = vmax.f32 %v477_v46, 0.0 }
 0x152   : > { %v481_v45 = vmax.f32 %v469_v43, 0.0  ;;  %v485_v51 = vpack.c.bf16 %v483_v49, %v482_v50 }
 0x154   : > { %v484_v47 = vpack.c.bf16 %v481_v45, %v480_v44 }
 0x156   : > { %627 = vmatmul.mubr.bf16.vlgmr.msra.gmra.mxu1 %v484_v47 }
 0x157   : > { %636 = vmatprep.mubr.bf16.mxu1 %v1437_v26  ;;  %1099 = vmatpush3.bf16.msra.mxu1 %v1226_v28 }
 0x158   : > { %1092 = vmatprep.subr.bf16.mxu1 %v1227_v29 }
 0x15b   : > { %1100 = vmatpush3.bf16.msra.mxu1 %v1228_v30  ;;  %v1009_v30 = vld [vmem:[%s1710_s6] ss:$0 sm:$0xff] }
 0x15c   : > { %1093 = vmatprep.subr.bf16.mxu1 %v1229_v31 }
 0x15e   : > { %637 = vmatmul.mubr.bf16.gmra.mxu1 %v485_v51 }
 0x15f   : > { %1101 = vmatpush3.bf16.msra.mxu1 %v1230_v32 }
 0x160   : > { %1094 = vmatprep.subr.bf16.mxu1 %v1231_v33 }
 0x163   : > { %1102 = vmatpush3.bf16.msra.mxu1 %v1232_v34 }
 0x164   : > { %1095 = vmatprep.subr.bf16.mxu1 %v1233_v35 }
 0x167   : > { %1103 = vmatpush3.bf16.msra.mxu1 %v1234_v36 }
 0x168   : > { %1096 = vmatprep.subr.bf16.mxu1 %v1235_v52 }
 0x16b   : > { %1104 = vmatpush3.bf16.msra.mxu1 %v1236_v53 }
 0x16c   : > { %1097 = vmatprep.subr.bf16.mxu1 %v1237_v54 }
 0x16f   : > { %1105 = vmatpush3.bf16.msra.mxu1 %v1238_v55 }
 0x170   : > { %1098 = vmatprep.subr.bf16.mxu1 %v1239_v56 }
 0x173   : > { %1106 = vmatpush3.bf16.msra.mxu1 %v1240_v57 }
 0x216   : > { %v628_v63 = vpop.f32.mrf.mxu1 }
 0x217   : > { %v629_v6 = vadd.f32 %v628_v63, %v507_v1 }
 0x218   : > { %v630_v2 = vpop.f32.mrf.mxu1 }
 0x219   : > { %v631_v4 = vadd.f32 %v630_v2, %v511_v0  ;;  %v647_v13 = vmax.f32 %v629_v6, 0.0 }
 0x21a   : > { %v632_v3 = vpop.f32.mrf.mxu1 }
 0x21b   : > { %v633_v5 = vadd.f32 %v632_v3, %v507_v1  ;;  %v648_v11 = vmax.f32 %v631_v4, 0.0 }
 0x21c   : > { %v634_v7 = vpop.f32.mrf.mxu1 }
 0x21d   : > { %v635_v8 = vadd.f32 %v634_v7, %v511_v0  ;;  %v649_v9 = vmax.f32 %v633_v5, 0.0 }
 0x21e   : > { %v638_v10 = vpop.f32.mrf.mxu1 }
 0x21f   : > { %v650_v12 = vmax.f32 %v635_v8, 0.0  ;;  %v655_v16 = vpack.c.bf16 %v649_v9, %v647_v13  ;;  %v639_v20 = vadd.f32 %v638_v10, %v507_v1 }
 0x220   : > { %v640_v14 = vpop.f32.mrf.mxu1 }
 0x221   : > { %v656_v15 = vpack.c.bf16 %v650_v12, %v648_v11  ;;  %v641_v18 = vadd.f32 %v640_v14, %v511_v0  ;;  %v651_v26 = vmax.f32 %v639_v20, 0.0 }
 0x222   : > { %v642_v17 = vpop.f32.mrf.mxu1 }
 0x223   : > { %v643_v19 = vadd.f32 %v642_v17, %v507_v1  ;;  %826 = vmatprep.mubr.bf16.mxu0 %v656_v15  ;;  %v652_v24 = vmax.f32 %v641_v18, 0.0 }
 0x224   : > { %v644_v21 = vpop.f32.mrf.mxu1  ;;  %827 = vmatmul.mubr.bf16.vlgmr.msra.gmra.mxu0 %v655_v16 }
 0x225   : > { %v645_v22 = vadd.f32 %v644_v21, %v511_v0  ;;  %v653_v23 = vmax.f32 %v643_v19, 0.0 }
 0x227   : > { %v654_v25 = vmax.f32 %v645_v22, 0.0  ;;  %v657_v28 = vpack.c.bf16 %v653_v23, %v651_v26 }
 0x229   : > { %v658_v27 = vpack.c.bf16 %v654_v25, %v652_v24 }
 0x22b   : > { %834 = vmatprep.mubr.bf16.mxu1 %v658_v27 }
 0x22c   : > { %835 = vmatmul.mubr.bf16.vlgmr.msra.gmra.mxu1 %v657_v28 }
 0x2e4   : > { %v1059_v29 = vpop.f32.mrf.mxu0 }
 0x2e6   : > { %v1060_v31 = vpop.f32.mrf.mxu0 }
 0x2e7   : > { %v1061_v32 = vadd.f32 %v1060_v31, %v1059_v29 }
 0x2e8   : > { %v1062_v33 = vpop.f32.mrf.mxu0 }
 0x2e9   : > { %v829_v34 = vadd.f32 %v1061_v32, %v1009_v30 }
 0x2ea   : > { %v1063_v35 = vpop.f32.mrf.mxu0 }
 0x2eb   : > { %1241 = vtanh.f32 %v829_v34  ;;  %v1064_v36 = vadd.f32 %v1063_v35, %v1062_v33 }
 0x2ec   : > { %v1065_v37 = vpop.f32.mrf.mxu1 }
 0x2ed   : > { %v832_v38 = vadd.f32 %v1064_v36, %v1009_v30 }
 0x2ee   : > { %v1066_v39 = vpop.f32.mrf.mxu1 }
 0x2ef   : > { %1243 = vtanh.f32 %v832_v38  ;;  %v1067_v40 = vadd.f32 %v1066_v39, %v1065_v37 }
 0x2f0   : > { %v1068_v41 = vpop.f32.mrf.mxu1 }
 0x2f1   : > { %v837_v42 = vadd.f32 %v1067_v40, %v1009_v30 }
 0x2f2   : > { %v1069_v43 = vpop.f32.mrf.mxu1 }
 0x2f3   : > { %1245 = vtanh.f32 %v837_v42  ;;  %v1070_v44 = vadd.f32 %v1069_v43, %v1068_v41 }
 0x2f5   : > { %v840_v45 = vadd.f32 %v1070_v44, %v1009_v30 }
 0x2f7   : > { %1247 = vtanh.f32 %v840_v45 }
 0x2f8   : > { %v1242_v46 = vpop.eup %1241 }
 0x2f9   : > { %847 = vst [vmem:[%s340_s22] sm:$0xff] %v1242_v46 }
 0x2fc   : > { %v1244_v47 = vpop.eup %1243 }
 0x2fd   : > { %848 = vst [vmem:[%s340_s22 + $0x8] sm:$0xff] %v1244_v47 }
 0x300   : > { %v1246_v48 = vpop.eup %1245 }
 0x301   : > { %849 = vst [vmem:[%s340_s22 + $0x10] sm:$0xff] %v1246_v48 }
 0x304   : > { %v1248_v49 = vpop.eup %1247 }
 0x305   : > { %850 = vst [vmem:[%s340_s22 + $0x18] sm:$0xff] %v1248_v49 }
 0x306   : > { %1368 = shalt.err (!%p1365_p9)
}
 0x307   : > { %s1369_s18 = scalar_lea.hbm %s1659_s29, 512  ;;  %s1373_s14 = scalar_lea.hbm %s1711_s7, 1024 }
 0x308   : > { %p1370_p1 = scmp.ne.s32.totalorder %s1659_s29, %s1369_s18  ;;  %p1374_p8 = scmp.lt.s32.totalorder %s1659_s29, %s1711_s7 }
 0x309   : > { %p1375_p3 = scmp.lt.s32.totalorder %s1373_s14, %s1369_s18 }
 0x30a   : > { %p1371_p4 = pnand %p1370_p1, %p1734_p12 }
 0x30b   : > { %p1376_p11 = por %p1375_p3, %p1374_p8 }
 0x30c   : > { %p1372_p6 = pneg %p1371_p4 }
 0x30e   : > { %p1377_p7 = pnand %p1376_p11, %p1372_p6 }
 0x310   : > { %1380 = shalt.err (!%p1377_p7)
}
 0x311   : > { %s1439_s10 = smov 128   ;;  %s1440_s1 = smov 8  }
 0x312   : > { %1121 = dma.vmem_to_hbm [thread:$0]  (%p1734_p12), %s1661_s16, 512, %s1659_s29, %s852_s15, %s1439_s10, %s1439_s10, %s1440_s1  }
 0x313 PF: > { %s880_s30 = sand.u32 1, %s1415_s24   ;;  %p1735_p13 = scmp.ne.s32.totalorder %s1720_s8, 0 }
 0x314   : > { %p1736_p0 = scmp.ge.s32.totalorder %s1427_s27, 2  ;;  %s881_s28 = scalar_lea.sflag [#allocation4], %s880_s30 }
 0x316   : > { %p1138_p5 = pnand %p1736_p0, %p1735_p13 }
 0x318   : > { %p1139_p10 = pneg %p1138_p5 }
 0x31a   : > { %1410 = dma.done.wait (%p1139_p10), %s881_s28, 512  }
 0x31b   : > { %1412 = vsyncadd (%p1139_p10), %s881_s28, 4294966784  ;;  %p22_p2 = scmp.ge.s32.totalorder %s1556_s13, 4   ;;  %s1737_s24 = smov %s1419_s25 }
 0x31c   : > { %s1738_s25 = smov %s1423_s26  ;;  %s1739_s26 = smov %s1577_s20 }
 0x31d   : > { %s1740_s27 = smov %s1556_s13  ;;  %24 = sbr.rel (!%p22_p2) target bundleno = 9 (0x9), region = 105 }
 0x322   :  { %886 = vsyncpa [#allocation3], 1 }
 0x323   :  { %888 = vsyncpa [#allocation3 + $0x1], 1 }
 0x324   :  { %889 = vsyncpa [#allocation6], 1 }
 0x325   :  { %890 = vsyncpa [#allocation9], 1 }
 0x326   :  { %891 = vsyncpa [#allocation4], 1 }
 0x327   :  { %893 = vsyncpa [#allocation4 + $0x1], 1 }

</bundles_post_ra>
